<compile_context>
chip_gen: v7x
topology: tpu7x:2x2x1
jax: 0.10.0
libtpu: 0.0.40
codegen_flags: <defaults>
</compile_context>

<pallas_src>
import functools

import jax
import jax.numpy as jnp
from jax.experimental import pallas as pl
from jax.experimental.pallas import tpu as pltpu


def _round_up(x, m):
    return ((x + m - 1) // m) * m


def _lstm_cell_kernel(xh_ref, cx_ref, w_ref, b_ref, out_ref, *,
                      hidden_size, out_cols):
    """One batch tile of the LSTM cell.

    xh_ref : [TB, K]        bf16   (concat of x and hx)
    cx_ref : [TB, H]        f32
    w_ref  : [K, 4H]        bf16   (resident: stacked [Wx^T; Wh^T])
    b_ref  : [1, 4H]        f32    (bx + bh)
    out_ref: [TB, out_cols] f32    ([hy | cy | in_gate | pad])
    """
    H = hidden_size

    # Single fused matmul on the MXU, f32 accumulation, bias folded once.
    gates = jnp.dot(xh_ref[...], w_ref[...],
                    preferred_element_type=jnp.float32) + b_ref[...]

    # Gate nonlinearities (sigmoid/tanh lower to the EUP slot; off VALU path).
    in_gate = jax.nn.sigmoid(gates[:, 0 * H:1 * H])
    forget_gate = jax.nn.sigmoid(gates[:, 1 * H:2 * H])
    new_cx = jnp.tanh(gates[:, 2 * H:3 * H])
    out_gate = jax.nn.sigmoid(gates[:, 3 * H:4 * H])

    cx = cx_ref[...]
    cy = cx * forget_gate + in_gate * new_cx
    hy = out_gate * jnp.tanh(cy)

    # Lane-dense output slab: one unmasked full-width store.
    pieces = [hy, cy, in_gate]
    pad = out_cols - 3 * H
    if pad > 0:
        pieces.append(jnp.zeros((hy.shape[0], pad), jnp.float32))
    out_ref[...] = jnp.concatenate(pieces, axis=1).astype(out_ref.dtype)


def pack_lstm_params(wx, bx, wh, bh, compute_dtype=jnp.bfloat16):
    """One-time parameter prep (do NOT call per step).

    wx: [4H, input_size], bx: [4H], wh: [4H, H], bh: [4H]
    Returns:
      w_packed: [input_size + H, 4H] in compute_dtype (stacked [Wx^T; Wh^T])
      b_packed: [1, 4H] float32 (bx + bh)
    """
    wx = jnp.asarray(wx)
    wh = jnp.asarray(wh)
    w_packed = jnp.concatenate([wx.T, wh.T], axis=0).astype(compute_dtype)
    b_packed = (jnp.asarray(bx, jnp.float32)
                + jnp.asarray(bh, jnp.float32)).reshape(1, -1)
    return w_packed, b_packed


def lstm_cell_forward(x, hx, cx, w_packed, b_packed, *, block_batch=256):
    """Pallas LSTMCell forward.

    x:  [B, input_size]
    hx: [B, H], cx: [B, H]
    w_packed/b_packed: from pack_lstm_params()
    Returns ((hy, cy), in_gate) like the torch module.
    """
    B, in_size = x.shape
    H = hx.shape[1]
    K = in_size + H
    assert w_packed.shape == (K, 4 * H)
    assert b_packed.shape == (1, 4 * H)

    # Per-step activation prep (cheap relative to resident weights).
    xh = jnp.concatenate([jnp.asarray(x), jnp.asarray(hx)],
                         axis=1).astype(w_packed.dtype)          # [B, K] bf16
    cx = jnp.asarray(cx, jnp.float32)                            # [B, H] f32

    # Batch tiling (sublane multiple of 8), pad batch so the grid divides it.
    TB = min(block_batch, _round_up(B, 8))
    B_pad = _round_up(B, TB)
    if B_pad != B:
        xh = jnp.pad(xh, ((0, B_pad - B), (0, 0)))
        cx = jnp.pad(cx, ((0, B_pad - B), (0, 0)))
    grid = (B_pad // TB,)

    # Lane-dense output slab width.
    out_cols = _round_up(3 * H, 128)

    # Explicit VMEM budget: resident weights/bias + double-buffered tiles
    # + the [TB, 4H] gates intermediate, with 2x headroom, capped at 64 MiB
    # (v7x physical VMEM per TensorCore).
    est = (w_packed.size * w_packed.dtype.itemsize
           + b_packed.size * 4
           + 2 * TB * (K * xh.dtype.itemsize + H * 4 + out_cols * 4)
           + TB * 4 * H * 4)
    vmem_limit = int(min(64 * 2 ** 20, max(16 * 2 ** 20, 2 * est)))

    kernel = functools.partial(_lstm_cell_kernel,
                               hidden_size=H, out_cols=out_cols)

    slab = pl.pallas_call(
        kernel,
        out_shape=jax.ShapeDtypeStruct((B_pad, out_cols), jnp.float32),
        grid_spec=pltpu.PrefetchScalarGridSpec(
            num_scalar_prefetch=0,
            grid=grid,
            in_specs=[
                pl.BlockSpec((TB, K), lambda i: (i, 0)),       # xh: batch-tiled
                pl.BlockSpec((TB, H), lambda i: (i, 0)),       # cx: batch-tiled
                pl.BlockSpec((K, 4 * H), lambda i: (0, 0)),    # weights resident
                pl.BlockSpec((1, 4 * H), lambda i: (0, 0)),    # bias resident
            ],
            out_specs=pl.BlockSpec((TB, out_cols), lambda i: (i, 0)),
        ),
        compiler_params=pltpu.CompilerParams(
            dimension_semantics=("parallel",),
            vmem_limit_bytes=vmem_limit,
        ),
    )(xh, cx, w_packed, b_packed)

    hy = slab[:B, 0 * H:1 * H]
    cy = slab[:B, 1 * H:2 * H]
    in_gate = slab[:B, 2 * H:3 * H]
    return (hy, cy), in_gate


def _reference(x, hx, cx, wx, bx, wh, bh, quantize=False):
    """Pure-JAX reference matching the torch module."""
    if quantize:
        q = lambda a: jnp.asarray(a, jnp.bfloat16).astype(jnp.float32)
        x, hx, wx, wh = q(x), q(hx), q(wx), q(wh)
    H = hx.shape[1]
    gates = x @ wx.T + bx + hx @ wh.T + bh
    i = jax.nn.sigmoid(gates[:, 0 * H:1 * H])
    f = jax.nn.sigmoid(gates[:, 1 * H:2 * H])
    g = jnp.tanh(gates[:, 2 * H:3 * H])
    o = jax.nn.sigmoid(gates[:, 3 * H:4 * H])
    cy = cx * f + i * g
    hy = o * jnp.tanh(cy)
    return (hy, cy), i


if __name__ == "__main__":
    batch = 8
    input_size = 16
    hidden_size = 32

    key = jax.random.PRNGKey(0)
    kx, kh, kc, k1, k2, k3, k4 = jax.random.split(key, 7)

    # Deterministic parameter init, mirroring reset_parameters():
    # uniform(-1/sqrt(hidden), 1/sqrt(hidden)) for every parameter.
    std = 1.0 / jnp.sqrt(jnp.float32(hidden_size))
    wx = jax.random.uniform(k1, (4 * hidden_size, input_size), jnp.float32, -std, std)
    bx = jax.random.uniform(k2, (4 * hidden_size,), jnp.float32, -std, std)
    wh = jax.random.uniform(k3, (4 * hidden_size, hidden_size), jnp.float32, -std, std)
    bh = jax.random.uniform(k4, (4 * hidden_size,), jnp.float32, -std, std)

    x = jax.random.normal(kx, (batch, input_size), jnp.float32)
    hx = jax.random.normal(kh, (batch, hidden_size), jnp.float32)
    cx = jax.random.normal(kc, (batch, hidden_size), jnp.float32)

    # One-time parameter packing (transpose + stack + bias fold), bf16 weights.
    w_packed, b_packed = pack_lstm_params(wx, bx, wh, bh)

    (hy, cy), in_gate = lstm_cell_forward(x, hx, cx, w_packed, b_packed)
    jax.block_until_ready((hy, cy, in_gate))

    # Tight check against the bf16-quantized-input reference.
    (hy_q, cy_q), ig_q = _reference(x, hx, cx, wx, bx, wh, bh, quantize=True)
    assert jnp.allclose(hy, hy_q, atol=2e-3, rtol=2e-3)
    assert jnp.allclose(cy, cy_q, atol=2e-3, rtol=2e-3)
    assert jnp.allclose(in_gate, ig_q, atol=2e-3, rtol=2e-3)

    # Loose check against the full-f32 torch-equivalent reference
    # (bf16 matmul operands loosen the tolerance vs the original 1e-5).
    (hy_r, cy_r), ig_r = _reference(x, hx, cx, wx, bx, wh, bh, quantize=False)
    assert jnp.allclose(hy, hy_r, atol=3e-2, rtol=3e-2)
    assert jnp.allclose(cy, cy_r, atol=3e-2, rtol=3e-2)
    assert jnp.allclose(in_gate, ig_r, atol=3e-2, rtol=3e-2)

    print("KERNEL_OK")
</pallas_src>

<mosaic_0001>
module attributes {stable_mosaic.version = 11 : i64} {
  func.func @_lstm_cell_kernel(%arg0: i32, %arg1: memref<8x48xbf16, #tpu.memory_space<vmem>>, %arg2: memref<8x32xf32, #tpu.memory_space<vmem>>, %arg3: memref<48x128xbf16, #tpu.memory_space<vmem>>, %arg4: memref<1x128xf32, #tpu.memory_space<vmem>>, %arg5: memref<8x128xf32, #tpu.memory_space<vmem>>) attributes {dimension_semantics = [#tpu.dimension_semantics<parallel>], iteration_bounds = array<i64: 1>, scalar_prefetch = 0 : i64, scratch_operands = 0 : i64, tpu.core_type = #tpu.core_type<tc>, window_params = [{transform_indices = @transform_0, window_bounds = array<i64: 8, 48>}, {transform_indices = @transform_1, window_bounds = array<i64: 8, 32>}, {pipeline_mode = #tpu.pipeline_mode<synchronous>, transform_indices = @transform_2, window_bounds = array<i64: 48, 128>}, {pipeline_mode = #tpu.pipeline_mode<synchronous>, transform_indices = @transform_3, window_bounds = array<i64: 1, 128>}, {transform_indices = @transform_4, window_bounds = array<i64: 8, 128>}]} {
    %c0 = arith.constant 0 : index
    %c0_0 = arith.constant 0 : index
    %0 = vector.load %arg1[%c0, %c0_0] : memref<8x48xbf16, #tpu.memory_space<vmem>>, vector<8x48xbf16>
    %c0_1 = arith.constant 0 : index
    %c0_2 = arith.constant 0 : index
    %1 = vector.load %arg3[%c0_1, %c0_2] : memref<48x128xbf16, #tpu.memory_space<vmem>>, vector<48x128xbf16>
    %cst = arith.constant dense<0.000000e+00> : vector<8x128xf32>
    %2 = tpu.matmul %0, %1, %cst {dimension_numbers = #tpu.dot_dimension_numbers<[1], [0], [0], [1], [0, 0, 1, 1], [], []>} : vector<8x48xbf16>, vector<48x128xbf16>, vector<8x128xf32> -> vector<8x128xf32>
    %c0_3 = arith.constant 0 : index
    %c0_4 = arith.constant 0 : index
    %3 = vector.load %arg4[%c0_3, %c0_4] : memref<1x128xf32, #tpu.memory_space<vmem>>, vector<1x128xf32>
    %4 = vector.broadcast %3 : vector<1x128xf32> to vector<8x128xf32>
    %5 = arith.addf %2, %4 : vector<8x128xf32>
    %6 = vector.extract_strided_slice %5 {offsets = [0, 0], sizes = [8, 32], strides = [1, 1]} : vector<8x128xf32> to vector<8x32xf32>
    %7 = arith.negf %6 : vector<8x32xf32>
    %8 = math.exp %7 : vector<8x32xf32>
    %cst_5 = arith.constant 1.000000e+00 : f32
    %9 = vector.broadcast %cst_5 : f32 to vector<8x32xf32>
    %10 = arith.addf %9, %8 : vector<8x32xf32>
    %11 = arith.divf %9, %10 : vector<8x32xf32>
    %12 = vector.extract_strided_slice %5 {offsets = [0, 32], sizes = [8, 32], strides = [1, 1]} : vector<8x128xf32> to vector<8x32xf32>
    %13 = arith.negf %12 : vector<8x32xf32>
    %14 = math.exp %13 : vector<8x32xf32>
    %cst_6 = arith.constant 1.000000e+00 : f32
    %15 = vector.broadcast %cst_6 : f32 to vector<8x32xf32>
    %16 = arith.addf %15, %14 : vector<8x32xf32>
    %17 = arith.divf %15, %16 : vector<8x32xf32>
    %18 = vector.extract_strided_slice %5 {offsets = [0, 64], sizes = [8, 32], strides = [1, 1]} : vector<8x128xf32> to vector<8x32xf32>
    %19 = math.tanh %18 : vector<8x32xf32>
    %20 = vector.extract_strided_slice %5 {offsets = [0, 96], sizes = [8, 32], strides = [1, 1]} : vector<8x128xf32> to vector<8x32xf32>
    %21 = arith.negf %20 : vector<8x32xf32>
    %22 = math.exp %21 : vector<8x32xf32>
    %cst_7 = arith.constant 1.000000e+00 : f32
    %23 = vector.broadcast %cst_7 : f32 to vector<8x32xf32>
    %24 = arith.addf %23, %22 : vector<8x32xf32>
    %25 = arith.divf %23, %24 : vector<8x32xf32>
    %c0_8 = arith.constant 0 : index
    %c0_9 = arith.constant 0 : index
    %26 = vector.load %arg2[%c0_8, %c0_9] : memref<8x32xf32, #tpu.memory_space<vmem>>, vector<8x32xf32>
    %27 = arith.mulf %26, %17 : vector<8x32xf32>
    %28 = arith.mulf %11, %19 : vector<8x32xf32>
    %29 = arith.addf %27, %28 : vector<8x32xf32>
    %30 = math.tanh %29 : vector<8x32xf32>
    %31 = arith.mulf %25, %30 : vector<8x32xf32>
    %cst_10 = arith.constant 0.000000e+00 : f32
    %32 = vector.broadcast %cst_10 : f32 to vector<8x32xf32>
    %33 = tpu.concatenate %31, %29, %11, %32 in 1 : vector<8x32xf32>, vector<8x32xf32>, vector<8x32xf32>, vector<8x32xf32> -> vector<8x128xf32>
    %c0_11 = arith.constant 0 : index
    %c0_12 = arith.constant 0 : index
    %34 = vector.load %arg5[%c0_11, %c0_12] : memref<8x128xf32, #tpu.memory_space<vmem>>, vector<8x128xf32>
    tpu.vector_store %arg5[%c0_11, %c0_12], %33 {strides = array<i32>} : memref<8x128xf32, #tpu.memory_space<vmem>>, vector<8x128xf32>,
    return
  }
  func.func @transform_0(%arg0: i32) -> (i32, i32) {
    %c0_i32 = arith.constant 0 : i32
    %c0_i32_0 = arith.constant 0 : i32
    return %arg0, %c0_i32 : i32, i32
  }
  func.func @transform_1(%arg0: i32) -> (i32, i32) {
    %c0_i32 = arith.constant 0 : i32
    %c0_i32_0 = arith.constant 0 : i32
    return %arg0, %c0_i32 : i32, i32
  }
  func.func @transform_2(%arg0: i32) -> (i32, i32) {
    %c0_i32 = arith.constant 0 : i32
    %c0_i32_0 = arith.constant 0 : i32
    %c0_i32_1 = arith.constant 0 : i32
    return %c0_i32, %c0_i32_0 : i32, i32
  }
  func.func @transform_3(%arg0: i32) -> (i32, i32) {
    %c0_i32 = arith.constant 0 : i32
    %c0_i32_0 = arith.constant 0 : i32
    %c0_i32_1 = arith.constant 0 : i32
    return %c0_i32, %c0_i32_0 : i32, i32
  }
  func.func @transform_4(%arg0: i32) -> (i32, i32) {
    %c0_i32 = arith.constant 0 : i32
    %c0_i32_0 = arith.constant 0 : i32
    return %arg0, %c0_i32 : i32, i32
  }
}

</mosaic_0001>

<bundles_post_ra>
// kernel: tpu_custom_call.1
= control target key start
LH: loop header
LB: loop body
LE: loop exit
PB: predicated region body
PF: predicated region fallthrough
CT: control target
= control target key end

     0   :  { %9 = vsyncpa [#allocation3], 0  ;;  %s416_s0 = inlined_call_operand.hbm [shape: bf16[8,48], index: 0, kind: input, shape index: {}]   ;;  %s417_s1 = inlined_call_operand.hbm [shape: f32[8,32], index: 1, kind: input, shape index: {}]   ;;  %s418_s2 = inlined_call_operand.hbm [shape: bf16[48,128], index: 2, kind: input, shape index: {}]   ;;  %s419_s3 = inlined_call_operand.vmem [shape: f32[1,128], index: 3, kind: input, shape index: {}]   ;;  %s420_s4 = inlined_call_operand.hbm [shape: f32[8,128], index: 4, kind: output, shape index: {}]  }
   0x1   :  { %10 = vsyncpa [#allocation6], 0 }
   0x2   :  { %11 = vsyncpa [#allocation4], 0  ;;  %s326_s15 = smov [#allocation5]   ;;  %s327_s17 = smov [#allocation2]  }
   0x3   :  { %s28_s16 = sshll.u32 %s326_s15, 4  ;;  %s18_s18 = sshll.u32 %s327_s17, 4  ;;  %s29_s16 = int_to_ptr.vmem [resolvable:$true] %s28_s16  ;;  %s19_s18 = int_to_ptr.vmem [resolvable:$true] %s18_s18 }
   0x4   :  { %s232_s21 = scalar_lea.hbm %s417_s1, 128 }
   0x5   :  { %p233_p0 = scmp.ne.s32.totalorder %s417_s1, %s232_s21  ;;  %p236_p1 = scmp.lt.u32.totalorder %s232_s21, %s417_s1 }
   0x7   :  { %p238_p2 = pnand %p236_p1, %p233_p0 }
   0x9   :  { %241 = shalt.err (!%p238_p2)
}
   0xa   :  { %s242_s26 = scalar_lea.vmem %s29_s16, 128  ;;  %p247_p4 = scmp.lt.s32.totalorder %s29_s16, %s29_s16 }
   0xb   :  { %p243_p3 = scmp.ne.s32.totalorder %s29_s16, %s242_s26  ;;  %p248_p5 = scmp.lt.s32.totalorder %s242_s26, %s242_s26 }
   0xd   :  { %p249_p6 = por %p248_p5, %p247_p4 }
   0xf   :  { %p250_p7 = pnand %p249_p6, %p243_p3 }
  0x11   :  { %253 = shalt.err (!%p250_p7)
}
  0x12   :  { %31 = dma.hbm_to_vmem [thread:$0]  %s417_s1, 128, %s29_s16, [#allocation6]  }
  0x13   :  { %s254_s5 = scalar_lea.hbm %s416_s0, 64 }
  0x14   :  { %p255_p8 = scmp.ne.s32.totalorder %s416_s0, %s254_s5  ;;  %p258_p9 = scmp.lt.u32.totalorder %s254_s5, %s416_s0 }
  0x16   :  { %p260_p10 = pnand %p258_p9, %p255_p8 }
  0x18   :  { %263 = shalt.err (!%p260_p10)
}
  0x19   :  { %s264_s10 = scalar_lea.vmem %s19_s18, 64  ;;  %p269_p12 = scmp.lt.s32.totalorder %s19_s18, %s19_s18 }
  0x1a   :  { %p265_p11 = scmp.ne.s32.totalorder %s19_s18, %s264_s10  ;;  %p270_p13 = scmp.lt.s32.totalorder %s264_s10, %s264_s10 }
  0x1c   :  { %p271_p0 = por %p270_p13, %p269_p12 }
  0x1e   :  { %p272_p1 = pnand %p271_p0, %p265_p11 }
  0x20   :  { %275 = shalt.err (!%p272_p1)
}
  0x21   :  { %21 = dma.hbm_to_vmem [thread:$0]  %s416_s0, 64, %s19_s18, [#allocation3]  }
  0x22   :  { %s328_s12 = smov [#allocation7]   ;;  %s276_s16 = scalar_lea.hbm %s418_s2, 384 }
  0x23   :  { %s37_s13 = sshll.u32 %s328_s12, 4  ;;  %p277_p2 = scmp.ne.s32.totalorder %s418_s2, %s276_s16  ;;  %s38_s13 = int_to_ptr.vmem [resolvable:$true] %s37_s13 }
  0x24   :  { %p280_p3 = scmp.lt.u32.totalorder %s276_s16, %s418_s2 }
  0x26   :  { %p282_p4 = pnand %p280_p3, %p277_p2 }
  0x28   :  { %285 = shalt.err (!%p282_p4)
}
  0x29   :  { %s286_s22 = scalar_lea.vmem %s38_s13, 384  ;;  %p291_p6 = scmp.lt.s32.totalorder %s38_s13, %s38_s13 }
  0x2a   :  { %p287_p5 = scmp.ne.s32.totalorder %s38_s13, %s286_s22  ;;  %p292_p7 = scmp.lt.s32.totalorder %s286_s22, %s286_s22 }
  0x2c   :  { %p293_p8 = por %p292_p7, %p291_p6 }
  0x2e   :  { %p294_p9 = pnand %p293_p8, %p287_p5 }
  0x30   :  { %297 = shalt.err (!%p294_p9)
}
  0x31   :  { %s329_s0 = smov 64   ;;  %s330_s18 = smov 4  }
  0x32   :  { %43 = dma.hbm_to_vmem [thread:$0]  %s418_s2, 384, %s38_s13, [#allocation6], %s329_s0, %s329_s0, %s330_s18  }
  0x33   :  { %320 = dma.done.wait [#allocation3], 64  }
  0x34   :  { %321 = vsyncadd [#allocation3], 4294967232 }
  0x35   :  { %322 = dma.done.wait [#allocation6], 512  }
  0x36   :  { %323 = vsyncadd [#allocation6], 4294966784  ;;  %v331_v0 = vmov 0.0   ;;  %vm332_vm0 = vmmov 0   ;;  %v221_v1 = vld [vmem:[#allocation7] sm:$0xff]   ;;  %v222_v2 = vld [vmem:[#allocation7 + $0x8] sm:$0xff]  }
  0x37   :  { %201 = vmatprep.subr.bf16.mxu0 %v331_v0  ;;  %207 = vmatprep.mubr.msk.bf16.mxu0 %vm332_vm0, %v331_v0  ;;  %v223_v3 = vld [vmem:[#allocation7 + $0x10] sm:$0xff]   ;;  %vm88_vm1 = vcmask 392192   ;;  %s333_s26 = smov 96   ;;  %v139_v17 = vld [vmem:[#allocation5] sm:$0xff]  ;;  %vm168_vm2 = vcmask 261120   ;;  %vm170_vm3 = vcmask 523264  }
  0x38   :  { %202 = vmatpush3.bf16.msra.mxu0 %v221_v1  ;;  %v56_v4 = vld [vmem:[#allocation2] sm:$0xf]  ;;  %s335_s27 = smov [#allocation8]   ;;  %vm172_vm4 = vcmask 785408  }
  0x39   :  { %203 = vmatprep.subr.bf16.mxu0 %v331_v0  ;;  %v191_v5 = vld [vmem:[%s419_s3] ss:$0 sm:$0xff]  ;;  %s334_s3 = smov 32   ;;  %s181_s28 = sshll.u32 %s335_s27, 4  ;;  %s182_s28 = int_to_ptr.vmem [resolvable:$true] %s181_s28 }
  0x3a   :  { %s298_s29 = scalar_lea.vmem %s182_s28, 128  ;;  %p303_p11 = scmp.lt.s32.totalorder %s182_s28, %s182_s28 }
  0x3b   :  { %p299_p10 = scmp.ne.s32.totalorder %s182_s28, %s298_s29  ;;  %p304_p12 = scmp.lt.s32.totalorder %s298_s29, %s298_s29 }
  0x3c   :  { %204 = vmatpush3.bf16.msra.mxu0 %v222_v2 }
  0x3d   :  { %205 = vmatprep.subr.bf16.mxu0 %v331_v0  ;;  %p305_p13 = por %p304_p12, %p303_p11 }
  0x3f   :  { %p306_p0 = pnand %p305_p13, %p299_p10 }
  0x40   :  { %206 = vmatpush3.bf16.msra.mxu0 %v223_v3 }
  0x43   :  { %208 = vmatmul.mubr.msk.bf16.vlgmr.msra.gmra.mrb[0].mxu0 %vm88_vm1, %v56_v4 }
 0x116   :  { %v126_v6 = vpop.f32.mrb[0].mxu0 }
 0x117   :  { %v127_v7 = vadd.f32 %v191_v5, %v126_v6  ;;  %v209_v8 = vpop.f32.mrb[1].mxu0 }
 0x118   :  { %v129_v9 = vpop.f32.mrb[2].mxu0 }
 0x119   :  { %v196_v10 = vmul.f32 -1.442695, %v127_v7  ;;  %v210_v11 = vpop.f32.mrb[3].mxu0 }
 0x11b   :  { %224 = vpow2.f32 %v196_v10 }
 0x125   :  { %v225_v12 = vpop.eup %224 }
 0x126   :  { %v135_v13 = vadd.f32 1.0, %v225_v12 }
 0x128   :  { %226 = vrcp.f32 %v135_v13 }
 0x129   :  { %228 = vtanh.f32 %v127_v7 }
 0x132   :  { %v227_v14 = vpop.eup %226 }
 0x133   :  { %141 = vrot.lane.b32.xlu0 %v227_v14, %s333_s26  ;;  %v229_v15 = vpop.eup %228 }
 0x137   :  { %146 = vrot.lane.b32.xlu0 %v229_v15, %s329_s0 }
 0x1a5   :  { %v142_v16 = vpop.permute.xlu0 %141 }
 0x1a6   :  { %v144_v19 = vmul.f32 %v142_v16, %v139_v17 }
 0x1a9   :  { %v147_v18 = vpop.permute.xlu0 %146 }
 0x1aa   :  { %v149_v20 = vmul.f32 %v227_v14, %v147_v18 }
 0x1ac   :  { %v150_v21 = vadd.f32 %v149_v20, %v144_v19 }
 0x1ae   :  { %230 = vtanh.f32 %v150_v21  ;;  %162 = vrot.lane.b32.xlu0 %v150_v21, %s334_s3 }
 0x1b8   :  { %v231_v22 = vpop.eup %230 }
 0x1b9   :  { %153 = vrot.lane.b32.xlu1 %v231_v22, %s333_s26 }
 0x220   :  { %v163_v26 = vpop.permute.xlu0 %162 }
 0x22b   :  { %v154_v23 = vpop.permute.xlu1 %153 }
 0x22c   :  { %v156_v24 = vmul.f32 %v227_v14, %v154_v23 }
 0x22e   :  { %158 = vrot.lane.b32.xlu1 %v156_v24, %s334_s3 }
 0x232   :  { %165 = vrot.lane.b32.xlu1 %v227_v14, %s329_s0 }
 0x2a0   :  { %v159_v25 = vpop.permute.xlu1 %158 }
 0x2a1   :  { %v169_v27 = vsel %vm168_vm2, %v159_v25, %v163_v26 }
 0x2a4   :  { %v166_v28 = vpop.permute.xlu1 %165 }
 0x2a5   :  { %v171_v29 = vsel %vm170_vm3, %v169_v27, %v166_v28 }
 0x2a6   :  { %v173_v30 = vsel %vm172_vm4, %v171_v29, 0.0 }
 0x2a7   :  { %174 = vst [vmem:[#allocation8] sm:$0xff] %v173_v30 }
 0x2a8   :  { %309 = shalt.err (!%p306_p0)
}
 0x2a9   :  { %s310_s6 = scalar_lea.hbm %s420_s4, 128 }
 0x2aa   :  { %p311_p1 = scmp.ne.s32.totalorder %s420_s4, %s310_s6  ;;  %p314_p2 = scmp.lt.u32.totalorder %s310_s6, %s420_s4 }
 0x2ac   :  { %p316_p3 = pnand %p314_p2, %p311_p1 }
 0x2ae   :  { %319 = shalt.err (!%p316_p3)
}
 0x2af   :  { %184 = dma.vmem_to_hbm [thread:$0]  %s182_s28, 128, %s420_s4, [#allocation4]  }
 0x2b0   :  { %324 = dma.done.wait [#allocation4], 128  }
 0x2b1   :  { %325 = vsyncadd [#allocation4], 4294967168 }
 0x2b2   :  { %188 = vsyncpa [#allocation3], 1 }
 0x2b3   :  { %189 = vsyncpa [#allocation6], 1 }
 0x2b4   :  { %190 = vsyncpa [#allocation4], 1 }

</bundles_post_ra>
